<compile_context>
chip_gen: v7x
topology: tpu7x:2x2x1
jax: 0.10.0
libtpu: 0.0.40
codegen_flags: <defaults>
</compile_context>

<pallas_src>
import functools

import jax
import jax.numpy as jnp
from jax.experimental import pallas as pl
from jax.experimental.pallas import tpu as pltpu


# ----------------------------------------------------------------------------
# Fused Pallas kernel: the entire forward for one batch tile.
# ----------------------------------------------------------------------------
def _fused_forward_kernel(x_ref, w1_ref, b1_ref, w2_ref, b2_ref, w3_ref, b3_ref,
                          wa1_ref, ba1_ref, wa2_ref, ba2_ref, o_ref):
    x = x_ref[...]                                                   # [TB, 256] bf16

    # Conv2d(3,16,2x2) + ReLU as one dense matmul with im2col folded into W1.
    # Output columns ordered (tap t in 0..3)*256 + (pool pos q in 0..8)*16 + c.
    h1 = jnp.dot(x, w1_ref[...], preferred_element_type=jnp.float32)
    h1 = jnp.maximum(h1 + b1_ref[...], 0.0)                          # [TB, 1024] f32

    # MaxPool2d(2,2): max over the 4 tap chunks (256-aligned lane slices).
    hp = jnp.maximum(jnp.maximum(h1[:, 0:256], h1[:, 256:512]),
                     jnp.maximum(h1[:, 512:768], h1[:, 768:1024]))   # [TB, 256]

    # Conv2d(16,32,2x2) + ReLU as dense matmul (bf16 operands, f32 acc).
    h2 = jnp.dot(hp.astype(jnp.bfloat16), w2_ref[...],
                 preferred_element_type=jnp.float32)
    h2 = jnp.maximum(h2 + b2_ref[...], 0.0)                          # [TB, 128]

    # Conv2d(32,64,2x2) + ReLU (spatially 2x2 -> 1x1, i.e. a linear layer).
    h3 = jnp.dot(h2.astype(jnp.bfloat16), w3_ref[...],
                 preferred_element_type=jnp.float32)
    h3 = jnp.maximum(h3 + b3_ref[...], 0.0)                          # [TB, 128]

    # actor: Linear(64,64) + Tanh, Linear(64,7) (padded to 128 lanes).
    a1 = jnp.tanh(jnp.dot(h3.astype(jnp.bfloat16), wa1_ref[...],
                          preferred_element_type=jnp.float32) + ba1_ref[...])
    out = jnp.dot(a1.astype(jnp.bfloat16), wa2_ref[...],
                  preferred_element_type=jnp.float32) + ba2_ref[...]
    o_ref[...] = out.astype(o_ref.dtype)                             # [TB, 128]


def _round_up(n, m):
    return ((n + m - 1) // m) * m


# ----------------------------------------------------------------------------
# Host-side glue: just flatten the raw image and pad to 256 lanes (bf16).
# ----------------------------------------------------------------------------
def _build_conv1_input(x):
    """[B, 7, 7, 3] NHWC -> [B, 256] bf16: raw pixels flattened (y,x,c)-major
    to 147 lanes, zero-padded to 256."""
    B = x.shape[0]
    x1 = x.reshape(B, 7 * 7 * 3)
    x1 = jnp.pad(x1, ((0, 0), (0, 256 - 147)))
    return x1.astype(jnp.bfloat16)


@functools.partial(jax.jit, static_argnames=("block_b",))
def policy_nn_forward(x, packed, block_b=1024):
    """x: [B, 7, 7, 3] float32 (NHWC, as received by the PyTorch module) -> [B, 7]."""
    (W1, b1, W2, b2, W3, b3, Wa1, ba1, Wa2, ba2) = packed
    B = x.shape[0]
    x1 = _build_conv1_input(x)                            # [B, 256] bf16

    SUB = 16                                              # bf16 sublane granularity
    block_b = max(SUB, _round_up(block_b, SUB))
    B16 = _round_up(B, SUB)
    # Aim for >= 2 batch tiles so v7x's second TensorCore gets work.
    TB = min(block_b, max(SUB, _round_up(-(-B16 // 2), SUB)))
    Bp = _round_up(B, TB)
    if Bp != B:
        x1 = jnp.pad(x1, ((0, Bp - B), (0, 0)))

    tile_spec = pl.BlockSpec((TB, 256), lambda i: (i, 0))
    out_spec = pl.BlockSpec((TB, 128), lambda i: (i, 0))

    def resident(arr):  # full array, constant block index -> VMEM-resident
        return pl.BlockSpec(arr.shape, lambda i: (0, 0))

    out = pl.pallas_call(
        _fused_forward_kernel,
        out_shape=jax.ShapeDtypeStruct((Bp, 128), jnp.float32),
        grid_spec=pltpu.PrefetchScalarGridSpec(
            num_scalar_prefetch=0,
            grid=(Bp // TB,),
            in_specs=[
                tile_spec,
                resident(W1), resident(b1),
                resident(W2), resident(b2),
                resident(W3), resident(b3),
                resident(Wa1), resident(ba1),
                resident(Wa2), resident(ba2),
            ],
            out_specs=out_spec,
        ),
        compiler_params=pltpu.CompilerParams(
            dimension_semantics=("parallel",),
            vmem_limit_bytes=32 * 1024 * 1024),
    )(x1, W1, b1, W2, b2, W3, b3, Wa1, ba1, Wa2, ba2)

    return out[:B, :7]


# ----------------------------------------------------------------------------
# Parameter packing: PyTorch-layout weights -> block-structured padded matrices
# (im2col folded into W1; weight matrices stored in bf16, biases in f32).
# ----------------------------------------------------------------------------
def pack_params(raw):
    f32 = jnp.float32

    # Conv1 with im2col folded in: rows index raw pixels r = (y*7 + x)*3 + ci
    # (147 valid rows, padded to 256); columns are (tap t)*256 + (pool q)*16 + co.
    W1 = jnp.zeros((256, 1024), f32)
    b1 = jnp.zeros((1, 1024), f32)
    for t, (ty, tx) in enumerate(((0, 0), (0, 1), (1, 0), (1, 1))):
        for qy in range(3):
            for qx in range(3):
                q = qy * 3 + qx
                c0 = t * 256 + q * 16
                b1 = b1.at[0, c0:c0 + 16].set(raw["b1"])
                for kh in range(2):
                    for kw in range(2):
                        y = 2 * qy + ty + kh
                        xc = 2 * qx + tx + kw
                        r0 = (y * 7 + xc) * 3
                        # [ci, co] block of the conv1 kernel at tap (kh, kw).
                        W1 = W1.at[r0:r0 + 3, c0:c0 + 16].set(
                            raw["w1"][:, :, kh, kw].T)

    W2 = jnp.zeros((256, 128), f32)
    b2 = jnp.tile(raw["b2"], 4).reshape(1, 128)
    for ry in range(2):
        for rx in range(2):
            r = ry * 2 + rx
            for dy in range(2):
                for dx in range(2):
                    q = (ry + dy) * 3 + (rx + dx)
                    W2 = W2.at[q * 16:(q + 1) * 16, r * 32:(r + 1) * 32].set(
                        raw["w2"][:, :, dy, dx].T)        # [c_in, c_out]

    W3 = jnp.zeros((128, 128), f32)
    b3 = jnp.zeros((1, 128), f32).at[0, :64].set(raw["b3"])
    for ry in range(2):
        for rx in range(2):
            r = ry * 2 + rx
            W3 = W3.at[r * 32:(r + 1) * 32, :64].set(raw["w3"][:, :, ry, rx].T)

    Wa1 = jnp.zeros((128, 128), f32).at[:64, :64].set(raw["wa1"].T)
    ba1 = jnp.zeros((1, 128), f32).at[0, :64].set(raw["ba1"])
    Wa2 = jnp.zeros((128, 128), f32).at[:64, :7].set(raw["wa2"].T)
    ba2 = jnp.zeros((1, 128), f32).at[0, :7].set(raw["ba2"])

    bf16 = jnp.bfloat16
    return (W1.astype(bf16), b1, W2.astype(bf16), b2, W3.astype(bf16), b3,
            Wa1.astype(bf16), ba1, Wa2.astype(bf16), ba2)


# ----------------------------------------------------------------------------
# Deterministic parameter init (PyTorch layouts).
# ----------------------------------------------------------------------------
def init_params(key):
    ks = jax.random.split(key, 10)

    def u(k, shape, fan_in):
        bound = 1.0 / jnp.sqrt(float(fan_in))
        return jax.random.uniform(k, shape, jnp.float32, -bound, bound)

    raw = {
        "w1": u(ks[0], (16, 3, 2, 2), 3 * 4),    # Conv2d OIHW
        "b1": u(ks[1], (16,), 3 * 4),
        "w2": u(ks[2], (32, 16, 2, 2), 16 * 4),
        "b2": u(ks[3], (32,), 16 * 4),
        "w3": u(ks[4], (64, 32, 2, 2), 32 * 4),
        "b3": u(ks[5], (64,), 32 * 4),
        "wa1": u(ks[6], (64, 64), 64),           # Linear [out, in]
        "ba1": u(ks[7], (64,), 64),
        "wa2": u(ks[8], (7, 64), 64),
        "ba2": u(ks[9], (7,), 64),
    }
    return raw, pack_params(raw)


# ----------------------------------------------------------------------------
# Pure-JAX f32 reference (mirrors the PyTorch forward exactly) for verification.
# ----------------------------------------------------------------------------
def reference_forward(x, raw):
    xc = jnp.transpose(x, (0, 3, 1, 2))  # NHWC -> NCHW (as torch.transpose x2)

    def conv(h, w, b):
        y = jax.lax.conv_general_dilated(
            h, w, (1, 1), "VALID",
            dimension_numbers=("NCHW", "OIHW", "NCHW"))
        return y + b[None, :, None, None]

    h = jnp.maximum(conv(xc, raw["w1"], raw["b1"]), 0.0)
    h = jax.lax.reduce_window(h, -jnp.inf, jax.lax.max,
                              (1, 1, 2, 2), (1, 1, 2, 2), "VALID")
    h = jnp.maximum(conv(h, raw["w2"], raw["b2"]), 0.0)
    h = jnp.maximum(conv(h, raw["w3"], raw["b3"]), 0.0)
    h = h.reshape(h.shape[0], -1)
    h = jnp.tanh(h @ raw["wa1"].T + raw["ba1"])
    return h @ raw["wa2"].T + raw["ba2"]


# TODO(synk): evolve()/evaluate() (parameter mutation + env rollout) are
# training/RL utilities with no kernel equivalent; only forward() is ported.

if __name__ == "__main__":
    key = jax.random.PRNGKey(0)
    k_x, k_p = jax.random.split(key)

    B = 2
    x = jax.random.uniform(k_x, (B, 7, 7, 3), jnp.float32)  # NHWC, 7x7 grid, 3 ch

    raw, packed = init_params(k_p)

    out = policy_nn_forward(x, packed)
    out = jax.block_until_ready(out)
    assert out.shape == (B, 7), out.shape

    ref = jax.block_until_ready(reference_forward(x, raw))
    # bf16 matmul operands + f32 accumulation -> loose tolerance vs f32 reference.
    max_err = jnp.max(jnp.abs(out - ref))
    assert jnp.allclose(out, ref, atol=5e-2, rtol=5e-2), f"max abs err {max_err}"
    # Policy semantics: greedy action must match.
    assert jnp.array_equal(jnp.argmax(out, axis=-1), jnp.argmax(ref, axis=-1))

    print("KERNEL_OK")
</pallas_src>

<mosaic_0001>
module attributes {stable_mosaic.version = 11 : i64} {
  func.func @_fused_forward_kernel(%arg0: i32, %arg1: memref<16x256xbf16, #tpu.memory_space<vmem>>, %arg2: memref<256x1024xbf16, #tpu.memory_space<vmem>>, %arg3: memref<1x1024xf32, #tpu.memory_space<vmem>>, %arg4: memref<256x128xbf16, #tpu.memory_space<vmem>>, %arg5: memref<1x128xf32, #tpu.memory_space<vmem>>, %arg6: memref<128x128xbf16, #tpu.memory_space<vmem>>, %arg7: memref<1x128xf32, #tpu.memory_space<vmem>>, %arg8: memref<128x128xbf16, #tpu.memory_space<vmem>>, %arg9: memref<1x128xf32, #tpu.memory_space<vmem>>, %arg10: memref<128x128xbf16, #tpu.memory_space<vmem>>, %arg11: memref<1x128xf32, #tpu.memory_space<vmem>>, %arg12: memref<16x128xf32, #tpu.memory_space<vmem>>) attributes {dimension_semantics = [#tpu.dimension_semantics<parallel>], iteration_bounds = array<i64: 1>, scalar_prefetch = 0 : i64, scratch_operands = 0 : i64, tpu.core_type = #tpu.core_type<tc>, window_params = [{transform_indices = @transform_0, window_bounds = array<i64: 16, 256>}, {pipeline_mode = #tpu.pipeline_mode<synchronous>, transform_indices = @transform_1, window_bounds = array<i64: 256, 1024>}, {pipeline_mode = #tpu.pipeline_mode<synchronous>, transform_indices = @transform_2, window_bounds = array<i64: 1, 1024>}, {pipeline_mode = #tpu.pipeline_mode<synchronous>, transform_indices = @transform_3, window_bounds = array<i64: 256, 128>}, {pipeline_mode = #tpu.pipeline_mode<synchronous>, transform_indices = @transform_4, window_bounds = array<i64: 1, 128>}, {pipeline_mode = #tpu.pipeline_mode<synchronous>, transform_indices = @transform_5, window_bounds = array<i64: 128, 128>}, {pipeline_mode = #tpu.pipeline_mode<synchronous>, transform_indices = @transform_6, window_bounds = array<i64: 1, 128>}, {pipeline_mode = #tpu.pipeline_mode<synchronous>, transform_indices = @transform_7, window_bounds = array<i64: 128, 128>}, {pipeline_mode = #tpu.pipeline_mode<synchronous>, transform_indices = @transform_8, window_bounds = array<i64: 1, 128>}, {pipeline_mode = #tpu.pipeline_mode<synchronous>, transform_indices = @transform_9, window_bounds = array<i64: 128, 128>}, {pipeline_mode = #tpu.pipeline_mode<synchronous>, transform_indices = @transform_10, window_bounds = array<i64: 1, 128>}, {transform_indices = @transform_11, window_bounds = array<i64: 16, 128>}]} {
    %c0 = arith.constant 0 : index
    %c0_0 = arith.constant 0 : index
    %0 = vector.load %arg1[%c0, %c0_0] : memref<16x256xbf16, #tpu.memory_space<vmem>>, vector<16x256xbf16>
    %c0_1 = arith.constant 0 : index
    %c0_2 = arith.constant 0 : index
    %1 = vector.load %arg2[%c0_1, %c0_2] : memref<256x1024xbf16, #tpu.memory_space<vmem>>, vector<256x1024xbf16>
    %cst = arith.constant dense<0.000000e+00> : vector<16x1024xf32>
    %2 = tpu.matmul %0, %1, %cst {dimension_numbers = #tpu.dot_dimension_numbers<[1], [0], [0], [1], [0, 0, 1, 1], [], []>} : vector<16x256xbf16>, vector<256x1024xbf16>, vector<16x1024xf32> -> vector<16x1024xf32>
    %c0_3 = arith.constant 0 : index
    %c0_4 = arith.constant 0 : index
    %3 = vector.load %arg3[%c0_3, %c0_4] : memref<1x1024xf32, #tpu.memory_space<vmem>>, vector<1x1024xf32>
    %4 = vector.broadcast %3 : vector<1x1024xf32> to vector<16x1024xf32>
    %5 = arith.addf %2, %4 : vector<16x1024xf32>
    %cst_5 = arith.constant 0.000000e+00 : f32
    %6 = vector.broadcast %cst_5 : f32 to vector<16x1024xf32>
    %7 = arith.maximumf %5, %6 : vector<16x1024xf32>
    %8 = vector.extract_strided_slice %7 {offsets = [0, 0], sizes = [16, 256], strides = [1, 1]} : vector<16x1024xf32> to vector<16x256xf32>
    %9 = vector.extract_strided_slice %7 {offsets = [0, 256], sizes = [16, 256], strides = [1, 1]} : vector<16x1024xf32> to vector<16x256xf32>
    %10 = arith.maximumf %8, %9 : vector<16x256xf32>
    %11 = vector.extract_strided_slice %7 {offsets = [0, 512], sizes = [16, 256], strides = [1, 1]} : vector<16x1024xf32> to vector<16x256xf32>
    %12 = vector.extract_strided_slice %7 {offsets = [0, 768], sizes = [16, 256], strides = [1, 1]} : vector<16x1024xf32> to vector<16x256xf32>
    %13 = arith.maximumf %11, %12 : vector<16x256xf32>
    %14 = arith.maximumf %10, %13 : vector<16x256xf32>
    %15 = arith.truncf %14 : vector<16x256xf32> to vector<16x256xbf16>
    %c0_6 = arith.constant 0 : index
    %c0_7 = arith.constant 0 : index
    %16 = vector.load %arg4[%c0_6, %c0_7] : memref<256x128xbf16, #tpu.memory_space<vmem>>, vector<256x128xbf16>
    %cst_8 = arith.constant dense<0.000000e+00> : vector<16x128xf32>
    %17 = tpu.matmul %15, %16, %cst_8 {dimension_numbers = #tpu.dot_dimension_numbers<[1], [0], [0], [1], [0, 0, 1, 1], [], []>} : vector<16x256xbf16>, vector<256x128xbf16>, vector<16x128xf32> -> vector<16x128xf32>
    %c0_9 = arith.constant 0 : index
    %c0_10 = arith.constant 0 : index
    %18 = vector.load %arg5[%c0_9, %c0_10] : memref<1x128xf32, #tpu.memory_space<vmem>>, vector<1x128xf32>
    %19 = vector.broadcast %18 : vector<1x128xf32> to vector<16x128xf32>
    %20 = arith.addf %17, %19 : vector<16x128xf32>
    %cst_11 = arith.constant 0.000000e+00 : f32
    %21 = vector.broadcast %cst_11 : f32 to vector<16x128xf32>
    %22 = arith.maximumf %20, %21 : vector<16x128xf32>
    %23 = arith.truncf %22 : vector<16x128xf32> to vector<16x128xbf16>
    %c0_12 = arith.constant 0 : index
    %c0_13 = arith.constant 0 : index
    %24 = vector.load %arg6[%c0_12, %c0_13] : memref<128x128xbf16, #tpu.memory_space<vmem>>, vector<128x128xbf16>
    %cst_14 = arith.constant dense<0.000000e+00> : vector<16x128xf32>
    %25 = tpu.matmul %23, %24, %cst_14 {dimension_numbers = #tpu.dot_dimension_numbers<[1], [0], [0], [1], [0, 0, 1, 1], [], []>} : vector<16x128xbf16>, vector<128x128xbf16>, vector<16x128xf32> -> vector<16x128xf32>
    %c0_15 = arith.constant 0 : index
    %c0_16 = arith.constant 0 : index
    %26 = vector.load %arg7[%c0_15, %c0_16] : memref<1x128xf32, #tpu.memory_space<vmem>>, vector<1x128xf32>
    %27 = vector.broadcast %26 : vector<1x128xf32> to vector<16x128xf32>
    %28 = arith.addf %25, %27 : vector<16x128xf32>
    %cst_17 = arith.constant 0.000000e+00 : f32
    %29 = vector.broadcast %cst_17 : f32 to vector<16x128xf32>
    %30 = arith.maximumf %28, %29 : vector<16x128xf32>
    %31 = arith.truncf %30 : vector<16x128xf32> to vector<16x128xbf16>
    %c0_18 = arith.constant 0 : index
    %c0_19 = arith.constant 0 : index
    %32 = vector.load %arg8[%c0_18, %c0_19] : memref<128x128xbf16, #tpu.memory_space<vmem>>, vector<128x128xbf16>
    %cst_20 = arith.constant dense<0.000000e+00> : vector<16x128xf32>
    %33 = tpu.matmul %31, %32, %cst_20 {dimension_numbers = #tpu.dot_dimension_numbers<[1], [0], [0], [1], [0, 0, 1, 1], [], []>} : vector<16x128xbf16>, vector<128x128xbf16>, vector<16x128xf32> -> vector<16x128xf32>
    %c0_21 = arith.constant 0 : index
    %c0_22 = arith.constant 0 : index
    %34 = vector.load %arg9[%c0_21, %c0_22] : memref<1x128xf32, #tpu.memory_space<vmem>>, vector<1x128xf32>
    %35 = vector.broadcast %34 : vector<1x128xf32> to vector<16x128xf32>
    %36 = arith.addf %33, %35 : vector<16x128xf32>
    %37 = math.tanh %36 : vector<16x128xf32>
    %38 = arith.truncf %37 : vector<16x128xf32> to vector<16x128xbf16>
    %c0_23 = arith.constant 0 : index
    %c0_24 = arith.constant 0 : index
    %39 = vector.load %arg10[%c0_23, %c0_24] : memref<128x128xbf16, #tpu.memory_space<vmem>>, vector<128x128xbf16>
    %cst_25 = arith.constant dense<0.000000e+00> : vector<16x128xf32>
    %40 = tpu.matmul %38, %39, %cst_25 {dimension_numbers = #tpu.dot_dimension_numbers<[1], [0], [0], [1], [0, 0, 1, 1], [], []>} : vector<16x128xbf16>, vector<128x128xbf16>, vector<16x128xf32> -> vector<16x128xf32>
    %c0_26 = arith.constant 0 : index
    %c0_27 = arith.constant 0 : index
    %41 = vector.load %arg11[%c0_26, %c0_27] : memref<1x128xf32, #tpu.memory_space<vmem>>, vector<1x128xf32>
    %42 = vector.broadcast %41 : vector<1x128xf32> to vector<16x128xf32>
    %43 = arith.addf %40, %42 : vector<16x128xf32>
    %c0_28 = arith.constant 0 : index
    %c0_29 = arith.constant 0 : index
    %44 = vector.load %arg12[%c0_28, %c0_29] : memref<16x128xf32, #tpu.memory_space<vmem>>, vector<16x128xf32>
    tpu.vector_store %arg12[%c0_28, %c0_29], %43 {strides = array<i32>} : memref<16x128xf32, #tpu.memory_space<vmem>>, vector<16x128xf32>,
    return
  }
  func.func @transform_0(%arg0: i32) -> (i32, i32) {
    %c0_i32 = arith.constant 0 : i32
    %c0_i32_0 = arith.constant 0 : i32
    return %arg0, %c0_i32 : i32, i32
  }
  func.func @transform_1(%arg0: i32) -> (i32, i32) {
    %c0_i32 = arith.constant 0 : i32
    %c0_i32_0 = arith.constant 0 : i32
    %c0_i32_1 = arith.constant 0 : i32
    return %c0_i32, %c0_i32_0 : i32, i32
  }
  func.func @transform_2(%arg0: i32) -> (i32, i32) {
    %c0_i32 = arith.constant 0 : i32
    %c0_i32_0 = arith.constant 0 : i32
    %c0_i32_1 = arith.constant 0 : i32
    return %c0_i32, %c0_i32_0 : i32, i32
  }
  func.func @transform_3(%arg0: i32) -> (i32, i32) {
    %c0_i32 = arith.constant 0 : i32
    %c0_i32_0 = arith.constant 0 : i32
    %c0_i32_1 = arith.constant 0 : i32
    return %c0_i32, %c0_i32_0 : i32, i32
  }
  func.func @transform_4(%arg0: i32) -> (i32, i32) {
    %c0_i32 = arith.constant 0 : i32
    %c0_i32_0 = arith.constant 0 : i32
    %c0_i32_1 = arith.constant 0 : i32
    return %c0_i32, %c0_i32_0 : i32, i32
  }
  func.func @transform_5(%arg0: i32) -> (i32, i32) {
    %c0_i32 = arith.constant 0 : i32
    %c0_i32_0 = arith.constant 0 : i32
    %c0_i32_1 = arith.constant 0 : i32
    return %c0_i32, %c0_i32_0 : i32, i32
  }
  func.func @transform_6(%arg0: i32) -> (i32, i32) {
    %c0_i32 = arith.constant 0 : i32
    %c0_i32_0 = arith.constant 0 : i32
    %c0_i32_1 = arith.constant 0 : i32
    return %c0_i32, %c0_i32_0 : i32, i32
  }
  func.func @transform_7(%arg0: i32) -> (i32, i32) {
    %c0_i32 = arith.constant 0 : i32
    %c0_i32_0 = arith.constant 0 : i32
    %c0_i32_1 = arith.constant 0 : i32
    return %c0_i32, %c0_i32_0 : i32, i32
  }
  func.func @transform_8(%arg0: i32) -> (i32, i32) {
    %c0_i32 = arith.constant 0 : i32
    %c0_i32_0 = arith.constant 0 : i32
    %c0_i32_1 = arith.constant 0 : i32
    return %c0_i32, %c0_i32_0 : i32, i32
  }
  func.func @transform_9(%arg0: i32) -> (i32, i32) {
    %c0_i32 = arith.constant 0 : i32
    %c0_i32_0 = arith.constant 0 : i32
    %c0_i32_1 = arith.constant 0 : i32
    return %c0_i32, %c0_i32_0 : i32, i32
  }
  func.func @transform_10(%arg0: i32) -> (i32, i32) {
    %c0_i32 = arith.constant 0 : i32
    %c0_i32_0 = arith.constant 0 : i32
    %c0_i32_1 = arith.constant 0 : i32
    return %c0_i32, %c0_i32_0 : i32, i32
  }
  func.func @transform_11(%arg0: i32) -> (i32, i32) {
    %c0_i32 = arith.constant 0 : i32
    %c0_i32_0 = arith.constant 0 : i32
    return %arg0, %c0_i32 : i32, i32
  }
}

</mosaic_0001>

<bundles_post_ra>
// kernel: policy_nn_forward.1
= control target key start
LH: loop header
LB: loop body
LE: loop exit
PB: predicated region body
PF: predicated region fallthrough
CT: control target
= control target key end

     0   :  { %16 = vsyncpa [#allocation3], 0  ;;  %s2294_s0 = inlined_call_operand.vmem [shape: bf16[16,256], index: 0, kind: input, shape index: {}]   ;;  %s2295_s1 = inlined_call_operand.hbm [shape: bf16[256,1024], index: 1, kind: input, shape index: {}]   ;;  %s2296_s2 = inlined_call_operand.vmem [shape: f32[1,1024], index: 2, kind: input, shape index: {}]   ;;  %s2297_s3 = inlined_call_operand.vmem [shape: bf16[256,128], index: 3, kind: input, shape index: {}]   ;;  %s2298_s4 = inlined_call_operand.vmem [shape: f32[1,128], index: 4, kind: input, shape index: {}]   ;;  %s2299_s5 = inlined_call_operand.vmem [shape: bf16[128,128], index: 5, kind: input, shape index: {}]   ;;  %s2300_s6 = inlined_call_operand.vmem [shape: f32[1,128], index: 6, kind: input, shape index: {}]   ;;  %s2301_s7 = inlined_call_operand.hbm [shape: bf16[128,128], index: 7, kind: input, shape index: {}]   ;;  %s2302_s8 = inlined_call_operand.vmem [shape: f32[1,128], index: 8, kind: input, shape index: {}]   ;;  %s2303_s9 = inlined_call_operand.hbm [shape: bf16[128,128], index: 9, kind: input, shape index: {}]   ;;  %s2304_s10 = inlined_call_operand.vmem [shape: f32[1,128], index: 10, kind: input, shape index: {}]   ;;  %s2305_s11 = inlined_call_operand.vmem [shape: f32[16,128], index: 11, kind: output, shape index: {}]  }
   0x1   :  { %17 = vsyncpa [#allocation5], 0  ;;  %s2042_s17 = smov [#allocation4]   ;;  %s1972_s21 = scalar_lea.hbm %s2301_s7, 1024 }
   0x2   :  { %s47_s18 = sshll.u32 %s2042_s17, 4  ;;  %p1973_p0 = scmp.ne.s32.totalorder %s2301_s7, %s1972_s21  ;;  %s48_s18 = int_to_ptr.vmem [resolvable:$true] %s47_s18 }
   0x3   :  { %p1976_p1 = scmp.lt.u32.totalorder %s1972_s21, %s2301_s7 }
   0x5   :  { %p1978_p2 = pnand %p1976_p1, %p1973_p0 }
   0x7   :  { %1981 = shalt.err (!%p1978_p2)
}
   0x8   :  { %s1982_s26 = scalar_lea.vmem %s48_s18, 1024  ;;  %p1987_p4 = scmp.lt.s32.totalorder %s48_s18, %s48_s18 }
   0x9   :  { %p1983_p3 = scmp.ne.s32.totalorder %s48_s18, %s1982_s26  ;;  %p1988_p5 = scmp.lt.s32.totalorder %s1982_s26, %s1982_s26 }
   0xb   :  { %p1989_p6 = por %p1988_p5, %p1987_p4 }
   0xd   :  { %p1990_p7 = pnand %p1989_p6, %p1983_p3 }
   0xf   :  { %1993 = shalt.err (!%p1990_p7)
}
  0x10   :  { %s2043_s27 = smov 64   ;;  %s2044_s28 = smov 4  }
  0x11   :  { %53 = dma.hbm_to_vmem [thread:$0]  %s2301_s7, 1024, %s48_s18, [#allocation5], %s2043_s27, %s2043_s27, %s2044_s28  }
  0x12   :  { %s2045_s12 = smov [#allocation2]   ;;  %s1994_s16 = scalar_lea.hbm %s2295_s1, 16384 }
  0x13   :  { %s25_s13 = sshll.u32 %s2045_s12, 4  ;;  %p1995_p8 = scmp.ne.s32.totalorder %s2295_s1, %s1994_s16  ;;  %s26_s13 = int_to_ptr.vmem [resolvable:$true] %s25_s13 }
  0x14   :  { %p1998_p9 = scmp.lt.u32.totalorder %s1994_s16, %s2295_s1 }
  0x16   :  { %p2000_p10 = pnand %p1998_p9, %p1995_p8 }
  0x18   :  { %2003 = shalt.err (!%p2000_p10)
}
  0x19   :  { %s2004_s22 = scalar_lea.vmem %s26_s13, 16384  ;;  %p2009_p12 = scmp.lt.s32.totalorder %s26_s13, %s26_s13 }
  0x1a   :  { %p2005_p11 = scmp.ne.s32.totalorder %s26_s13, %s2004_s22  ;;  %p2010_p13 = scmp.lt.s32.totalorder %s2004_s22, %s2004_s22 }
  0x1c   :  { %p2011_p0 = por %p2010_p13, %p2009_p12 }
  0x1e   :  { %p2012_p1 = pnand %p2011_p0, %p2005_p11 }
  0x20   :  { %2015 = shalt.err (!%p2012_p1)
}
  0x21   :  { %s2046_s7 = smov 512   ;;  %s2047_s18 = smov 32  }
  0x22   :  { %31 = dma.hbm_to_vmem [thread:$0]  %s2295_s1, 16384, %s26_s13, [#allocation3], %s2046_s7, %s2046_s7, %s2047_s18  }
  0x23   :  { %s2048_s25 = smov [#allocation6]   ;;  %s2016_s12 = scalar_lea.hbm %s2303_s9, 1024 }
  0x24   :  { %s61_s26 = sshll.u32 %s2048_s25, 4  ;;  %p2017_p2 = scmp.ne.s32.totalorder %s2303_s9, %s2016_s12  ;;  %s62_s26 = int_to_ptr.vmem [resolvable:$true] %s61_s26 }
  0x25   :  { %p2020_p3 = scmp.lt.u32.totalorder %s2016_s12, %s2303_s9 }
  0x27   :  { %p2022_p4 = pnand %p2020_p3, %p2017_p2 }
  0x29   :  { %2025 = shalt.err (!%p2022_p4)
}
  0x2a   :  { %s2026_s19 = scalar_lea.vmem %s62_s26, 1024  ;;  %p2031_p6 = scmp.lt.s32.totalorder %s62_s26, %s62_s26 }
  0x2b   :  { %p2027_p5 = scmp.ne.s32.totalorder %s62_s26, %s2026_s19  ;;  %p2032_p7 = scmp.lt.s32.totalorder %s2026_s19, %s2026_s19 }
  0x2d   :  { %p2033_p8 = por %p2032_p7, %p2031_p6 }
  0x2f   :  { %p2034_p9 = pnand %p2033_p8, %p2027_p5 }
  0x31   :  { %2037 = shalt.err (!%p2034_p9)
}
  0x32   :  { %67 = dma.hbm_to_vmem [thread:$0]  %s2303_s9, 1024, %s62_s26, [#allocation5], %s2043_s27, %s2043_s27, %s2044_s28  }
  0x33   :  { %2038 = dma.done.wait [#allocation3], 16384  }
  0x34   :  { %2039 = vsyncadd [#allocation3], 4294950912 }
  0x35   :  { %2040 = dma.done.wait [#allocation5], 2048  }
  0x36   :  { %2041 = vsyncadd [#allocation5], 4294965248  ;;  %v82_v0 = vld [vmem:[#allocation2] sm:$0xff]  ;;  %v83_v2 = vld [vmem:[#allocation2 + $0x8] sm:$0xff]  ;;  %vm2050_vm0 = vmmov 0  }
  0x37   :  { %v86_v1 = vld [vmem:[#allocation2 + $0x20] sm:$0xff]  ;;  %v87_v4 = vld [vmem:[#allocation2 + $0x28] sm:$0xff] }
  0x38   :  { %v1636_v3 = vcombine.high %v82_v0, %v86_v1  ;;  %v1635_v5 = vcombine.low %v82_v0, %v86_v1  ;;  %v90_v6 = vld [vmem:[#allocation2 + $0x40] sm:$0xff]  ;;  %v1638_v8 = vcombine.high %v83_v2, %v87_v4  ;;  %v1637_v9 = vcombine.low %v83_v2, %v87_v4  ;;  %v91_v11 = vld [vmem:[#allocation2 + $0x48] sm:$0xff] }
  0x39   :  { %v94_v7 = vld [vmem:[#allocation2 + $0x60] sm:$0xff]  ;;  %v95_v12 = vld [vmem:[#allocation2 + $0x68] sm:$0xff] }
  0x3a   :  { %v1644_v10 = vcombine.high %v90_v6, %v94_v7  ;;  %v98_v13 = vld [vmem:[#allocation2 + $0x80] sm:$0xff]  ;;  %902 = vmatprep.subr.bf16.mxu0 %v1636_v3  ;;  %v1646_v14 = vcombine.high %v91_v11, %v95_v12  ;;  %v99_v16 = vld [vmem:[#allocation2 + $0x88] sm:$0xff]  ;;  %945 = vmatprep.subr.bf16.mxu1 %v1638_v8  ;;  %v1643_v18 = vcombine.low %v90_v6, %v94_v7 }
  0x3b   :  { %v102_v15 = vld [vmem:[#allocation2 + $0xa0] sm:$0xff]  ;;  %v103_v17 = vld [vmem:[#allocation2 + $0xa8] sm:$0xff]  ;;  %903 = vmatpush1.bf16.msra.mxu0 %v1635_v5  ;;  %946 = vmatpush1.bf16.msra.mxu1 %v1637_v9  ;;  %v1645_v19 = vcombine.low %v91_v11, %v95_v12 }
  0x3c   :  { %904 = vmatprep.subr.bf16.mxu0 %v1644_v10  ;;  %v1652_v20 = vcombine.high %v98_v13, %v102_v15  ;;  %947 = vmatprep.subr.bf16.mxu1 %v1646_v14  ;;  %v1654_v21 = vcombine.high %v99_v16, %v103_v17  ;;  %v106_v22 = vld [vmem:[#allocation2 + $0xc0] sm:$0xff]  ;;  %v107_v24 = vld [vmem:[#allocation2 + $0xc8] sm:$0xff]  ;;  %v1651_v26 = vcombine.low %v98_v13, %v102_v15 }
  0x3d   :  { %v110_v23 = vld [vmem:[#allocation2 + $0xe0] sm:$0xff]  ;;  %v111_v25 = vld [vmem:[#allocation2 + $0xe8] sm:$0xff]  ;;  %v1653_v27 = vcombine.low %v99_v16, %v103_v17 }
  0x3e   :  { %v1660_v28 = vcombine.high %v106_v22, %v110_v23  ;;  %v1662_v29 = vcombine.high %v107_v24, %v111_v25  ;;  %v114_v30 = vld [vmem:[#allocation2 + $0x100] sm:$0xff]  ;;  %v115_v32 = vld [vmem:[#allocation2 + $0x108] sm:$0xff]  ;;  %v1659_v34 = vcombine.low %v106_v22, %v110_v23  ;;  %v1661_v35 = vcombine.low %v107_v24, %v111_v25 }
  0x3f   :  { %905 = vmatpush1.bf16.msra.mxu0 %v1643_v18  ;;  %948 = vmatpush1.bf16.msra.mxu1 %v1645_v19  ;;  %v118_v31 = vld [vmem:[#allocation2 + $0x120] sm:$0xff]  ;;  %v119_v33 = vld [vmem:[#allocation2 + $0x128] sm:$0xff] }
  0x40   :  { %906 = vmatprep.subr.bf16.mxu0 %v1652_v20  ;;  %949 = vmatprep.subr.bf16.mxu1 %v1654_v21  ;;  %v1668_v36 = vcombine.high %v114_v30, %v118_v31  ;;  %v1670_v37 = vcombine.high %v115_v32, %v119_v33  ;;  %v122_v38 = vld [vmem:[#allocation2 + $0x140] sm:$0xff]  ;;  %v123_v40 = vld [vmem:[#allocation2 + $0x148] sm:$0xff]  ;;  %v1667_v42 = vcombine.low %v114_v30, %v118_v31 }
  0x41   :  { %v126_v39 = vld [vmem:[#allocation2 + $0x160] sm:$0xff]  ;;  %v127_v41 = vld [vmem:[#allocation2 + $0x168] sm:$0xff]  ;;  %v1669_v43 = vcombine.low %v115_v32, %v119_v33 }
  0x42   :  { %v1676_v44 = vcombine.high %v122_v38, %v126_v39  ;;  %v1678_v45 = vcombine.high %v123_v40, %v127_v41  ;;  %v130_v46 = vld [vmem:[#allocation2 + $0x180] sm:$0xff]  ;;  %v131_v48 = vld [vmem:[#allocation2 + $0x188] sm:$0xff]  ;;  %v1675_v50 = vcombine.low %v122_v38, %v126_v39  ;;  %v1677_v51 = vcombine.low %v123_v40, %v127_v41 }
  0x43   :  { %907 = vmatpush1.bf16.msra.mxu0 %v1651_v26  ;;  %950 = vmatpush1.bf16.msra.mxu1 %v1653_v27  ;;  %v134_v47 = vld [vmem:[#allocation2 + $0x1a0] sm:$0xff]  ;;  %v135_v49 = vld [vmem:[#allocation2 + $0x1a8] sm:$0xff] }
  0x44   :  { %908 = vmatprep.subr.bf16.mxu0 %v1660_v28  ;;  %951 = vmatprep.subr.bf16.mxu1 %v1662_v29  ;;  %v1684_v52 = vcombine.high %v130_v46, %v134_v47  ;;  %v1686_v53 = vcombine.high %v131_v48, %v135_v49  ;;  %v138_v54 = vld [vmem:[#allocation2 + $0x1c0] sm:$0xff]  ;;  %v139_v57 = vld [vmem:[#allocation2 + $0x1c8] sm:$0xff]  ;;  %v1683_v59 = vcombine.low %v130_v46, %v134_v47 }
  0x45   :  { %v142_v55 = vld [vmem:[#allocation2 + $0x1e0] sm:$0xff]  ;;  %v143_v58 = vld [vmem:[#allocation2 + $0x1e8] sm:$0xff]  ;;  %v1685_v60 = vcombine.low %v131_v48, %v135_v49 }
  0x46   :  { %v2156_v56 = vld [vmem:[%s2294_s0 + $0x4] ss:$8 sps:$4 sm:$0xff]   ;;  %v1692_v61 = vcombine.high %v138_v54, %v142_v55  ;;  %v1694_v62 = vcombine.high %v139_v57, %v143_v58  ;;  %v1691_v3 = vcombine.low %v138_v54, %v142_v55  ;;  %v1693_v4 = vcombine.low %v139_v57, %v143_v58 }
  0x47   :  { %909 = vmatpush1.bf16.msra.mxu0 %v1659_v34  ;;  %952 = vmatpush1.bf16.msra.mxu1 %v1661_v35  ;;  %v146_v63 = vld [vmem:[#allocation2 + $0x200] sm:$0xff]  ;;  %v147_v1 = vld [vmem:[#allocation2 + $0x208] sm:$0xff] }
  0x48   :  { %910 = vmatprep.subr.bf16.mxu0 %v1668_v36  ;;  %953 = vmatprep.subr.bf16.mxu1 %v1670_v37  ;;  %v150_v0 = vld [vmem:[#allocation2 + $0x220] sm:$0xff]  ;;  %v151_v2 = vld [vmem:[#allocation2 + $0x228] sm:$0xff] }
  0x49   :  { %934 = vmatprep.mubr.bf16.mxu0 %v2156_v56  ;;  %977 = vmatprep.mubr.bf16.mxu1 %v2156_v56  ;;  %v1700_v5 = vcombine.high %v146_v63, %v150_v0  ;;  %v1702_v6 = vcombine.high %v147_v1, %v151_v2  ;;  %v154_v7 = vld [vmem:[#allocation2 + $0x240] sm:$0xff]  ;;  %v155_v9 = vld [vmem:[#allocation2 + $0x248] sm:$0xff]  ;;  %v1699_v11 = vcombine.low %v146_v63, %v150_v0 }
  0x4a   :  { %v158_v8 = vld [vmem:[#allocation2 + $0x260] sm:$0xff]  ;;  %v159_v10 = vld [vmem:[#allocation2 + $0x268] sm:$0xff]  ;;  %v1701_v12 = vcombine.low %v147_v1, %v151_v2  ;;  %v85_v1 = vld [vmem:[#allocation2 + $0x18] sm:$0xff] }
  0x4b   :  { %911 = vmatpush1.bf16.msra.mxu0 %v1667_v42  ;;  %954 = vmatpush1.bf16.msra.mxu1 %v1669_v43  ;;  %v1708_v13 = vcombine.high %v154_v7, %v158_v8  ;;  %v1710_v14 = vcombine.high %v155_v9, %v159_v10  ;;  %v162_v15 = vld [vmem:[#allocation2 + $0x280] sm:$0xff]  ;;  %v163_v17 = vld [vmem:[#allocation2 + $0x288] sm:$0xff]  ;;  %v1707_v19 = vcombine.low %v154_v7, %v158_v8  ;;  %v89_v2 = vld [vmem:[#allocation2 + $0x38] sm:$0xff] }
  0x4c   :  { %912 = vmatprep.subr.bf16.mxu0 %v1676_v44  ;;  %955 = vmatprep.subr.bf16.mxu1 %v1678_v45  ;;  %v166_v16 = vld [vmem:[#allocation2 + $0x2a0] sm:$0xff]  ;;  %v167_v18 = vld [vmem:[#allocation2 + $0x2a8] sm:$0xff]  ;;  %v1709_v20 = vcombine.low %v155_v9, %v159_v10  ;;  %v93_v10 = vld [vmem:[#allocation2 + $0x58] sm:$0xff] }
  0x4d   :  { %v1716_v21 = vcombine.high %v162_v15, %v166_v16  ;;  %v1718_v22 = vcombine.high %v163_v17, %v167_v18  ;;  %v170_v23 = vld [vmem:[#allocation2 + $0x2c0] sm:$0xff]  ;;  %v171_v25 = vld [vmem:[#allocation2 + $0x2c8] sm:$0xff]  ;;  %v1715_v27 = vcombine.low %v162_v15, %v166_v16  ;;  %v1717_v28 = vcombine.low %v163_v17, %v167_v18  ;;  %v104_v15 = vld [vmem:[#allocation2 + $0xb0] sm:$0xff] }
  0x4e   :  { %v174_v24 = vld [vmem:[#allocation2 + $0x2e0] sm:$0xff]  ;;  %v175_v26 = vld [vmem:[#allocation2 + $0x2e8] sm:$0xff]  ;;  %v1641_v16 = vcombine.low %v85_v1, %v89_v2  ;;  %v101_v18 = vld [vmem:[#allocation2 + $0x98] sm:$0xff] }
  0x4f   :  { %913 = vmatpush1.bf16.msra.mxu0 %v1675_v50  ;;  %956 = vmatpush1.bf16.msra.mxu1 %v1677_v51  ;;  %v1724_v29 = vcombine.high %v170_v23, %v174_v24  ;;  %v1726_v30 = vcombine.high %v171_v25, %v175_v26  ;;  %v178_v31 = vld [vmem:[#allocation2 + $0x300] sm:$0xff]  ;;  %v179_v33 = vld [vmem:[#allocation2 + $0x308] sm:$0xff]  ;;  %v1723_v35 = vcombine.low %v170_v23, %v174_v24  ;;  %v112_v23 = vld [vmem:[#allocation2 + $0xf0] sm:$0xff] }
  0x50   :  { %914 = vmatprep.subr.bf16.mxu0 %v1684_v52  ;;  %957 = vmatprep.subr.bf16.mxu1 %v1686_v53  ;;  %v182_v32 = vld [vmem:[#allocation2 + $0x320] sm:$0xff]  ;;  %v183_v34 = vld [vmem:[#allocation2 + $0x328] sm:$0xff]  ;;  %v1725_v38 = vcombine.low %v171_v25, %v175_v26 }
  0x51   :  { %v186_v36 = vld [vmem:[#allocation2 + $0x340] sm:$0xff]  ;;  %v1732_v39 = vcombine.high %v178_v31, %v182_v32  ;;  %v187_v40 = vld [vmem:[#allocation2 + $0x348] sm:$0xff]  ;;  %v1734_v42 = vcombine.high %v179_v33, %v183_v34  ;;  %v1731_v43 = vcombine.low %v178_v31, %v182_v32  ;;  %v1733_v46 = vcombine.low %v179_v33, %v183_v34  ;;  %v116_v33 = vld [vmem:[#allocation2 + $0x110] sm:$0xff] }
  0x52   :  { %v190_v37 = vld [vmem:[#allocation2 + $0x360] sm:$0xff]  ;;  %v191_v41 = vld [vmem:[#allocation2 + $0x368] sm:$0xff]  ;;  %v120_v34 = vld [vmem:[#allocation2 + $0x130] sm:$0xff] }
  0x53   :  { %915 = vmatpush1.bf16.msra.mxu0 %v1683_v59  ;;  %958 = vmatpush1.bf16.msra.mxu1 %v1685_v60  ;;  %v194_v44 = vld [vmem:[#allocation2 + $0x380] sm:$0xff]  ;;  %v1740_v47 = vcombine.high %v186_v36, %v190_v37  ;;  %v195_v48 = vld [vmem:[#allocation2 + $0x388] sm:$0xff]  ;;  %v1742_v50 = vcombine.high %v187_v40, %v191_v41  ;;  %v1739_v51 = vcombine.low %v186_v36, %v190_v37  ;;  %v121_v36 = vld [vmem:[#allocation2 + $0x138] sm:$0xff] }
  0x54   :  { %916 = vmatprep.subr.bf16.mxu0 %v1692_v61  ;;  %959 = vmatprep.subr.bf16.mxu1 %v1694_v62  ;;  %v198_v45 = vld [vmem:[#allocation2 + $0x3a0] sm:$0xff]  ;;  %v199_v49 = vld [vmem:[#allocation2 + $0x3a8] sm:$0xff]  ;;  %v1741_v54 = vcombine.low %v187_v40, %v191_v41  ;;  %v84_v61 = vld [vmem:[#allocation2 + $0x10] sm:$0xff] }
  0x55   :  { %v202_v52 = vld [vmem:[#allocation2 + $0x3c0] sm:$0xff]  ;;  %v1748_v55 = vcombine.high %v194_v44, %v198_v45  ;;  %v203_v57 = vld [vmem:[#allocation2 + $0x3c8] sm:$0xff]  ;;  %v1750_v59 = vcombine.high %v195_v48, %v199_v49  ;;  %v1747_v60 = vcombine.low %v194_v44, %v198_v45  ;;  %v88_v62 = vld [vmem:[#allocation2 + $0x30] sm:$0xff]  ;;  %v1749_v63 = vcombine.low %v195_v48, %v199_v49 }
  0x56   :  { %v206_v53 = vld [vmem:[#allocation2 + $0x3e0] sm:$0xff]  ;;  %v207_v58 = vld [vmem:[#allocation2 + $0x3e8] sm:$0xff]  ;;  %v1640_v9 = vcombine.high %v84_v61, %v88_v62  ;;  %v124_v40 = vld [vmem:[#allocation2 + $0x150] sm:$0xff]  ;;  %v1671_v44 = vcombine.low %v116_v33, %v120_v34 }
  0x57   :  { %917 = vmatpush1.bf16.msra.mxu0 %v1691_v3  ;;  %960 = vmatpush1.bf16.msra.mxu1 %v1693_v4  ;;  %v1756_v0 = vcombine.high %v202_v52, %v206_v53  ;;  %v1758_v3 = vcombine.high %v203_v57, %v207_v58  ;;  %v1755_v4 = vcombine.low %v202_v52, %v206_v53  ;;  %v2163_v8 = vld [vmem:[%s2294_s0] ss:$8 sps:$4 sm:$0xff]   ;;  %v128_v41 = vld [vmem:[#allocation2 + $0x170] sm:$0xff] }
  0x58   :  { %918 = vmatprep.subr.bf16.mxu0 %v1700_v5  ;;  %961 = vmatprep.subr.bf16.mxu1 %v1702_v6  ;;  %v92_v5 = vld [vmem:[#allocation2 + $0x50] sm:$0xff]  ;;  %v1757_v7 = vcombine.low %v203_v57, %v207_v58  ;;  %v1679_v52 = vcombine.low %v124_v40, %v128_v41 }
  0x59   :  { %v96_v6 = vld [vmem:[#allocation2 + $0x70] sm:$0xff] }
  0x5a   :  { %v1648_v17 = vcombine.high %v92_v5, %v96_v6  ;;  %v132_v48 = vld [vmem:[#allocation2 + $0x190] sm:$0xff] }
  0x5b   :  { %919 = vmatpush1.bf16.msra.mxu0 %v1699_v11  ;;  %962 = vmatpush1.bf16.msra.mxu1 %v1701_v12  ;;  %v97_v11 = vld [vmem:[#allocation2 + $0x78] sm:$0xff]  ;;  %v1642_v12 = vcombine.high %v85_v1, %v89_v2  ;;  %v136_v49 = vld [vmem:[#allocation2 + $0x1b0] sm:$0xff] }
  0x5c   :  { %920 = vmatprep.subr.bf16.mxu0 %v1708_v13  ;;  %963 = vmatprep.subr.bf16.mxu1 %v1710_v14  ;;  %v1639_v13 = vcombine.low %v84_v61, %v88_v62  ;;  %v100_v14 = vld [vmem:[#allocation2 + $0x90] sm:$0xff]  ;;  %v1649_v24 = vcombine.low %v93_v10, %v97_v11  ;;  %v1687_v61 = vcombine.low %v132_v48, %v136_v49 }
  0x5d   :  { %v1656_v25 = vcombine.high %v100_v14, %v104_v15  ;;  %v140_v57 = vld [vmem:[#allocation2 + $0x1d0] sm:$0xff] }
  0x5e   :  { %v144_v58 = vld [vmem:[#allocation2 + $0x1f0] sm:$0xff] }
  0x5f   :  { %921 = vmatpush1.bf16.msra.mxu0 %v1707_v19  ;;  %964 = vmatpush1.bf16.msra.mxu1 %v1709_v20  ;;  %v105_v19 = vld [vmem:[#allocation2 + $0xb8] sm:$0xff]  ;;  %v1650_v20 = vcombine.high %v93_v10, %v97_v11  ;;  %v148_v1 = vld [vmem:[#allocation2 + $0x210] sm:$0xff] }
  0x60   :  { %922 = vmatprep.subr.bf16.mxu0 %v1716_v21  ;;  %965 = vmatprep.subr.bf16.mxu1 %v1718_v22  ;;  %v1647_v21 = vcombine.low %v92_v5, %v96_v6  ;;  %v108_v22 = vld [vmem:[#allocation2 + $0xd0] sm:$0xff]  ;;  %v1658_v26 = vcombine.high %v101_v18, %v105_v19  ;;  %v1695_v5 = vcombine.low %v140_v57, %v144_v58 }
  0x61   :  { %v1664_v31 = vcombine.high %v108_v22, %v112_v23  ;;  %v1663_v37 = vcombine.low %v108_v22, %v112_v23  ;;  %v152_v2 = vld [vmem:[#allocation2 + $0x230] sm:$0xff] }
  0x62   :  { %v156_v10 = vld [vmem:[#allocation2 + $0x250] sm:$0xff] }
  0x63   :  { %923 = vmatpush1.bf16.msra.mxu0 %v1715_v27  ;;  %966 = vmatpush1.bf16.msra.mxu1 %v1717_v28  ;;  %v109_v27 = vld [vmem:[#allocation2 + $0xd8] sm:$0xff]  ;;  %v160_v11 = vld [vmem:[#allocation2 + $0x270] sm:$0xff] }
  0x64   :  { %924 = vmatprep.subr.bf16.mxu0 %v1724_v29  ;;  %967 = vmatprep.subr.bf16.mxu1 %v1726_v30  ;;  %v113_v28 = vld [vmem:[#allocation2 + $0xf8] sm:$0xff]  ;;  %v1655_v29 = vcombine.low %v100_v14, %v104_v15  ;;  %v1657_v30 = vcombine.low %v101_v18, %v105_v19  ;;  %v1703_v14 = vcombine.low %v148_v1, %v152_v2  ;;  %v164_v18 = vld [vmem:[#allocation2 + $0x290] sm:$0xff] }
  0x65   :  { %v1666_v32 = vcombine.high %v109_v27, %v113_v28  ;;  %v168_v19 = vld [vmem:[#allocation2 + $0x2b0] sm:$0xff]  ;;  %v1711_v22 = vcombine.low %v156_v10, %v160_v11 }
  0x67   :  { %925 = vmatpush1.bf16.msra.mxu0 %v1723_v35  ;;  %968 = vmatpush1.bf16.msra.mxu1 %v1725_v38  ;;  %v117_v35 = vld [vmem:[#allocation2 + $0x118] sm:$0xff]  ;;  %v1665_v38 = vcombine.low %v109_v27, %v113_v28  ;;  %v176_v27 = vld [vmem:[#allocation2 + $0x2f0] sm:$0xff] }
  0x68   :  { %926 = vmatprep.subr.bf16.mxu0 %v1732_v39  ;;  %969 = vmatprep.subr.bf16.mxu1 %v1734_v42  ;;  %v1672_v39 = vcombine.high %v116_v33, %v120_v34  ;;  %v125_v42 = vld [vmem:[#allocation2 + $0x158] sm:$0xff]  ;;  %v1673_v45 = vcombine.low %v117_v35, %v121_v36  ;;  %v180_v34 = vld [vmem:[#allocation2 + $0x310] sm:$0xff] }
  0x69   :  { %v173_v28 = vld [vmem:[#allocation2 + $0x2d8] sm:$0xff] }
  0x6b   :  { %927 = vmatpush1.bf16.msra.mxu0 %v1731_v43  ;;  %970 = vmatpush1.bf16.msra.mxu1 %v1733_v46  ;;  %v129_v43 = vld [vmem:[#allocation2 + $0x178] sm:$0xff]  ;;  %v1680_v46 = vcombine.high %v124_v40, %v128_v41  ;;  %v188_v41 = vld [vmem:[#allocation2 + $0x350] sm:$0xff] }
  0x6c   :  { %928 = vmatprep.subr.bf16.mxu0 %v1740_v47  ;;  %971 = vmatprep.subr.bf16.mxu1 %v1742_v50  ;;  %v1682_v47 = vcombine.high %v125_v42, %v129_v43  ;;  %v133_v50 = vld [vmem:[#allocation2 + $0x198] sm:$0xff]  ;;  %v1681_v53 = vcombine.low %v125_v42, %v129_v43  ;;  %v192_v42 = vld [vmem:[#allocation2 + $0x370] sm:$0xff] }
  0x6d   :  { %v189_v43 = vld [vmem:[#allocation2 + $0x358] sm:$0xff] }
  0x6f   :  { %929 = vmatpush1.bf16.msra.mxu0 %v1739_v51  ;;  %972 = vmatpush1.bf16.msra.mxu1 %v1741_v54  ;;  %v137_v51 = vld [vmem:[#allocation2 + $0x1b8] sm:$0xff]  ;;  %v1688_v54 = vcombine.high %v132_v48, %v136_v49  ;;  %v196_v49 = vld [vmem:[#allocation2 + $0x390] sm:$0xff] }
  0x70   :  { %930 = vmatprep.subr.bf16.mxu0 %v1748_v55  ;;  %973 = vmatprep.subr.bf16.mxu1 %v1750_v59  ;;  %v1690_v55 = vcombine.high %v133_v50, %v137_v51  ;;  %v141_v59 = vld [vmem:[#allocation2 + $0x1d8] sm:$0xff]  ;;  %v1689_v62 = vcombine.low %v133_v50, %v137_v51  ;;  %v200_v50 = vld [vmem:[#allocation2 + $0x3b0] sm:$0xff] }
  0x71   :  { %v197_v51 = vld [vmem:[#allocation2 + $0x398] sm:$0xff] }
  0x73   :  { %931 = vmatpush1.bf16.msra.mxu0 %v1747_v60  ;;  %974 = vmatpush1.bf16.msra.mxu1 %v1749_v63  ;;  %v145_v60 = vld [vmem:[#allocation2 + $0x1f8] sm:$0xff]  ;;  %v1696_v63 = vcombine.high %v140_v57, %v144_v58  ;;  %v204_v58 = vld [vmem:[#allocation2 + $0x3d0] sm:$0xff] }
  0x74   :  { %932 = vmatprep.subr.bf16.mxu0 %v1756_v0  ;;  %975 = vmatprep.subr.bf16.mxu1 %v1758_v3  ;;  %v1698_v0 = vcombine.high %v141_v59, %v145_v60  ;;  %v149_v3 = vld [vmem:[#allocation2 + $0x218] sm:$0xff]  ;;  %v1697_v6 = vcombine.low %v141_v59, %v145_v60  ;;  %v208_v59 = vld [vmem:[#allocation2 + $0x3f0] sm:$0xff] }
  0x75   :  { %v205_v60 = vld [vmem:[#allocation2 + $0x3d8] sm:$0xff] }
  0x77   :  { %933 = vmatpush1.bf16.msra.mxu0 %v1755_v4  ;;  %976 = vmatpush1.bf16.msra.mxu1 %v1757_v7  ;;  %v153_v4 = vld [vmem:[#allocation2 + $0x238] sm:$0xff]  ;;  %v1704_v7 = vcombine.high %v148_v1, %v152_v2  ;;  %v1759_v2 = vcombine.low %v204_v58, %v208_v59 }
  0x78   :  { %988 = vmatprep.subr.bf16.mxu0 %v1640_v9  ;;  %1031 = vmatprep.subr.bf16.mxu1 %v1642_v12  ;;  %v1706_v9 = vcombine.high %v149_v3, %v153_v4  ;;  %v157_v12 = vld [vmem:[#allocation2 + $0x258] sm:$0xff]  ;;  %v1705_v15 = vcombine.low %v149_v3, %v153_v4  ;;  %v1928_v4 = vld [vmem:[%s2297_s3 + $0x40] sm:$0xff]  }
  0x7a   :  { %935 = vmatmul.mubr.bf16.vlgmr.msra.gmra.mrb[0].mxu0 %v2163_v8  ;;  %978 = vmatmul.mubr.bf16.vlgmr.msra.gmra.mrb[0].mxu1 %v2163_v8 }
  0x7b   :  { %989 = vmatpush1.bf16.msra.mxu0 %v1639_v13  ;;  %1032 = vmatpush1.bf16.msra.mxu1 %v1641_v16  ;;  %v161_v13 = vld [vmem:[#allocation2 + $0x278] sm:$0xff]  ;;  %v1712_v16 = vcombine.high %v156_v10, %v160_v11 }
  0x7c   :  { %990 = vmatprep.subr.bf16.mxu0 %v1648_v17  ;;  %1033 = vmatprep.subr.bf16.mxu1 %v1650_v20  ;;  %v1714_v17 = vcombine.high %v157_v12, %v161_v13  ;;  %v165_v20 = vld [vmem:[#allocation2 + $0x298] sm:$0xff]  ;;  %v1713_v23 = vcombine.low %v157_v12, %v161_v13  ;;  %v1936_v12 = vld [vmem:[%s2297_s3 + $0x60] sm:$0xff]  }
  0x7d   :  { %1020 = vmatprep.mubr.bf16.mxu0 %v2156_v56  ;;  %1063 = vmatprep.mubr.bf16.mxu1 %v2156_v56  ;;  %v1674_v56 = vcombine.high %v117_v35, %v121_v36  ;;  %v184_v35 = vld [vmem:[#allocation2 + $0x330] sm:$0xff]  ;;  %v181_v36 = vld [vmem:[#allocation2 + $0x318] sm:$0xff]  ;;  %v1937_v13 = vld [vmem:[%s2297_s3 + $0x20] sm:$0xff]  }
  0x7e   :  { %v1934_v10 = vld [vmem:[%s2297_s3 + $0x58] sm:$0xff]  }
  0x7f   :  { %991 = vmatpush1.bf16.msra.mxu0 %v1647_v21  ;;  %1034 = vmatpush1.bf16.msra.mxu1 %v1649_v24  ;;  %v169_v21 = vld [vmem:[#allocation2 + $0x2b8] sm:$0xff]  ;;  %v1720_v24 = vcombine.high %v164_v18, %v168_v19 }
  0x80   :  { %992 = vmatprep.subr.bf16.mxu0 %v1656_v25  ;;  %1035 = vmatprep.subr.bf16.mxu1 %v1658_v26  ;;  %v1722_v25 = vcombine.high %v165_v20, %v169_v21  ;;  %v172_v26 = vld [vmem:[#allocation2 + $0x2d0] sm:$0xff]  ;;  %v1935_v11 = vld [vmem:[%s2297_s3 + $0x18] sm:$0xff]  }
  0x83   :  { %993 = vmatpush1.bf16.msra.mxu0 %v1655_v29  ;;  %1036 = vmatpush1.bf16.msra.mxu1 %v1657_v30  ;;  %v177_v29 = vld [vmem:[#allocation2 + $0x2f8] sm:$0xff]  ;;  %v1719_v30 = vcombine.low %v164_v18, %v168_v19 }
  0x84   :  { %994 = vmatprep.subr.bf16.mxu0 %v1664_v31  ;;  %1037 = vmatprep.subr.bf16.mxu1 %v1666_v32  ;;  %v1721_v31 = vcombine.low %v165_v20, %v169_v21  ;;  %v1728_v32 = vcombine.high %v172_v26, %v176_v27  ;;  %v1730_v33 = vcombine.high %v173_v28, %v177_v29  ;;  %v1942_v18 = vld [vmem:[%s2297_s3 + $0x78] sm:$0xff]   ;;  %v1944_v20 = vld [vmem:[%s2299_s5] sm:$0xff]   ;;  %v2049_v21 = vmov 0.0  }
  0x85   :  { %v1943_v19 = vld [vmem:[%s2297_s3 + $0x38] sm:$0xff]  }
  0x87   :  { %995 = vmatpush1.bf16.msra.mxu0 %v1663_v37  ;;  %1038 = vmatpush1.bf16.msra.mxu1 %v1665_v38  ;;  %v185_v37 = vld [vmem:[#allocation2 + $0x338] sm:$0xff]  ;;  %v1727_v38 = vcombine.low %v172_v26, %v176_v27  ;;  %v212_v26 = vlaneseq }
  0x88   :  { %996 = vmatprep.subr.bf16.mxu0 %v1672_v39  ;;  %1039 = vmatprep.subr.bf16.mxu1 %v1674_v56  ;;  %v1729_v39 = vcombine.low %v173_v28, %v177_v29  ;;  %v1736_v56 = vcombine.high %v180_v34, %v184_v35  ;;  %v1738_v40 = vcombine.high %v181_v36, %v185_v37  ;;  %v210_v29 = vld [vmem:[%s2296_s2] sm:$0xff] }
  0x89   :  { %v213_v27 = vshrl.u32 %v212_v26, 7 }
  0x8b   :  { %997 = vmatpush1.bf16.msra.mxu0 %v1671_v44  ;;  %1040 = vmatpush1.bf16.msra.mxu1 %v1673_v45  ;;  %v193_v44 = vld [vmem:[#allocation2 + $0x378] sm:$0xff]  ;;  %v1735_v45 = vcombine.low %v180_v34, %v184_v35  ;;  %v214_v28 = vsub.s32 0, %v213_v27 }
  0x8c   :  { %998 = vmatprep.subr.bf16.mxu0 %v1680_v46  ;;  %1041 = vmatprep.subr.bf16.mxu1 %v1682_v47  ;;  %v1737_v46 = vcombine.low %v181_v36, %v185_v37  ;;  %v1744_v47 = vcombine.high %v188_v41, %v192_v42  ;;  %v1746_v48 = vcombine.high %v189_v43, %v193_v44 }
  0x8f   :  { %999 = vmatpush1.bf16.msra.mxu0 %v1679_v52  ;;  %1042 = vmatpush1.bf16.msra.mxu1 %v1681_v53  ;;  %v201_v52 = vld [vmem:[#allocation2 + $0x3b8] sm:$0xff]  ;;  %v1743_v53 = vcombine.low %v188_v41, %v192_v42 }
  0x90   :  { %1000 = vmatprep.subr.bf16.mxu0 %v1688_v54  ;;  %1043 = vmatprep.subr.bf16.mxu1 %v1690_v55  ;;  %v1745_v54 = vcombine.low %v189_v43, %v193_v44  ;;  %v1752_v55 = vcombine.high %v196_v49, %v200_v50  ;;  %v1754_v57 = vcombine.high %v197_v51, %v201_v52 }
  0x93   :  { %1001 = vmatpush1.bf16.msra.mxu0 %v1687_v61  ;;  %1044 = vmatpush1.bf16.msra.mxu1 %v1689_v62  ;;  %v209_v61 = vld [vmem:[#allocation2 + $0x3f8] sm:$0xff]  ;;  %v1751_v62 = vcombine.low %v196_v49, %v200_v50 }
  0x94   :  { %1002 = vmatprep.subr.bf16.mxu0 %v1696_v63  ;;  %1045 = vmatprep.subr.bf16.mxu1 %v1698_v0  ;;  %v1753_v63 = vcombine.low %v197_v51, %v201_v52  ;;  %v1760_v0 = vcombine.high %v204_v58, %v208_v59  ;;  %v1762_v1 = vcombine.high %v205_v60, %v209_v61 }
  0x95   :  { %v1761_v3 = vcombine.low %v205_v60, %v209_v61 }
  0x97   :  { %1003 = vmatpush1.bf16.msra.mxu0 %v1695_v5  ;;  %1046 = vmatpush1.bf16.msra.mxu1 %v1697_v6  ;;  %v1929_v5 = vld [vmem:[%s2297_s3] sm:$0xff]   ;;  %v1930_v6 = vld [vmem:[%s2297_s3 + $0x48] sm:$0xff]  }
  0x98   :  { %1004 = vmatprep.subr.bf16.mxu0 %v1704_v7  ;;  %1047 = vmatprep.subr.bf16.mxu1 %v1706_v9  ;;  %v1931_v7 = vld [vmem:[%s2297_s3 + $0x8] sm:$0xff]   ;;  %v1933_v9 = vld [vmem:[%s2297_s3 + $0x10] sm:$0xff]  }
  0x9b   :  { %1005 = vmatpush1.bf16.msra.mxu0 %v1703_v14  ;;  %1048 = vmatpush1.bf16.msra.mxu1 %v1705_v15  ;;  %v1938_v14 = vld [vmem:[%s2297_s3 + $0x68] sm:$0xff]  }
  0x9c   :  { %1006 = vmatprep.subr.bf16.mxu0 %v1712_v16  ;;  %1049 = vmatprep.subr.bf16.mxu1 %v1714_v17  ;;  %v1939_v15 = vld [vmem:[%s2297_s3 + $0x28] sm:$0xff]   ;;  %v1940_v16 = vld [vmem:[%s2297_s3 + $0x70] sm:$0xff]  }
  0x9d   :  { %v1941_v17 = vld [vmem:[%s2297_s3 + $0x30] sm:$0xff]  }
  0x9f   :  { %1007 = vmatpush1.bf16.msra.mxu0 %v1711_v22  ;;  %1050 = vmatpush1.bf16.msra.mxu1 %v1713_v23  ;;  %v1945_v22 = vld [vmem:[%s2299_s5 + $0x8] sm:$0xff]   ;;  %v1946_v23 = vld [vmem:[%s2299_s5 + $0x10] sm:$0xff]  }
  0xa0   :  { %1008 = vmatprep.subr.bf16.mxu0 %v1720_v24  ;;  %1051 = vmatprep.subr.bf16.mxu1 %v1722_v25  ;;  %v1947_v24 = vld [vmem:[%s2299_s5 + $0x18] sm:$0xff]   ;;  %v1948_v25 = vld [vmem:[%s2299_s5 + $0x20] sm:$0xff]  }
  0xa3   :  { %1009 = vmatpush1.bf16.msra.mxu0 %v1719_v30  ;;  %1052 = vmatpush1.bf16.msra.mxu1 %v1721_v31  ;;  %v222_v30 = vsub.s32 2, %v213_v27  ;;  %v218_v31 = vsub.s32 1, %v213_v27 }
  0xa4   :  { %1010 = vmatprep.subr.bf16.mxu0 %v1728_v32  ;;  %1053 = vmatprep.subr.bf16.mxu1 %v1730_v33  ;;  %v226_v32 = vsub.s32 3, %v213_v27  ;;  %v215_v33 = vrot.slane %v210_v29, %v214_v28 }
  0xa5   :  { %v223_v34 = vrot.slane %v210_v29, %v222_v30  ;;  %v219_v35 = vrot.slane %v210_v29, %v218_v31 }
  0xa6   :  { %v227_v36 = vrot.slane %v210_v29, %v226_v32 }
  0xa7   :  { %1011 = vmatpush1.bf16.msra.mxu0 %v1727_v38  ;;  %1054 = vmatpush1.bf16.msra.mxu1 %v1729_v39 }
  0xa8   :  { %1012 = vmatprep.subr.bf16.mxu0 %v1736_v56  ;;  %1055 = vmatprep.subr.bf16.mxu1 %v1738_v40 }
  0xab   :  { %1013 = vmatpush1.bf16.msra.mxu0 %v1735_v45  ;;  %1056 = vmatpush1.bf16.msra.mxu1 %v1737_v46 }
  0xac   :  { %1014 = vmatprep.subr.bf16.mxu0 %v1744_v47  ;;  %1057 = vmatprep.subr.bf16.mxu1 %v1746_v48 }
  0xaf   :  { %1015 = vmatpush1.bf16.msra.mxu0 %v1743_v53  ;;  %1058 = vmatpush1.bf16.msra.mxu1 %v1745_v54 }
  0xb0   :  { %1016 = vmatprep.subr.bf16.mxu0 %v1752_v55  ;;  %1059 = vmatprep.subr.bf16.mxu1 %v1754_v57 }
  0xb3   :  { %1017 = vmatpush1.bf16.msra.mxu0 %v1751_v62  ;;  %1060 = vmatpush1.bf16.msra.mxu1 %v1753_v63 }
  0xb4   :  { %1018 = vmatprep.subr.bf16.mxu0 %v1760_v0  ;;  %1061 = vmatprep.subr.bf16.mxu1 %v1762_v1  ;;  %v230_v1 = vsub.s32 4, %v213_v27 }
  0xb7   :  { %1019 = vmatpush1.bf16.msra.mxu0 %v1759_v2  ;;  %1062 = vmatpush1.bf16.msra.mxu1 %v1761_v3  ;;  %v238_v2 = vsub.s32 6, %v213_v27  ;;  %v234_v3 = vsub.s32 5, %v213_v27 }
  0xb8   :  { %1807 = vmatprep.subr.bf16.mxu0 %v1928_v4  ;;  %1856 = vmatprep.subr.bf16.mxu1 %v2049_v21  ;;  %v242_v4 = vsub.s32 7, %v213_v27 }
  0xba   :  { %1021 = vmatmul.mubr.bf16.vlgmr.msra.gmra.mrb[4].mxu0 %v2163_v8  ;;  %1064 = vmatmul.mubr.bf16.vlgmr.msra.gmra.mrb[4].mxu1 %v2163_v8  ;;  %v1932_v8 = vld [vmem:[%s2297_s3 + $0x50] sm:$0xff]  }
  0xbb   :  { %1808 = vmatpush3.bf16.msra.mxu0 %v1929_v5  ;;  %1857 = vmatpush3.bf16.msra.mxu1 %v1944_v20  ;;  %v231_v5 = vrot.slane %v210_v29, %v230_v1  ;;  %v1958_v1 = vld [vmem:[#allocation4 + $0x30] sm:$0xff]  }
  0xbc   :  { %1809 = vmatprep.subr.bf16.mxu0 %v1930_v6  ;;  %1858 = vmatprep.subr.bf16.mxu1 %v2049_v21  ;;  %v239_v6 = vrot.slane %v210_v29, %v238_v2  ;;  %v1959_v2 = vld [vmem:[#allocation4 + $0x38] sm:$0xff]  }
  0xbd   :  { %1872 = vmatprep.mubr.msk.bf16.mxu1 %vm2050_vm0, %v2049_v21 }
  0xbf   :  { %1810 = vmatpush3.bf16.msra.mxu0 %v1931_v7  ;;  %1859 = vmatpush3.bf16.msra.mxu1 %v1945_v22  ;;  %v235_v7 = vrot.slane %v210_v29, %v234_v3  ;;  %v1960_v3 = vld [vmem:[#allocation6] sm:$0xff]  }
  0xc0   :  { %1811 = vmatprep.subr.bf16.mxu0 %v1932_v8  ;;  %1860 = vmatprep.subr.bf16.mxu1 %v2049_v21  ;;  %v243_v8 = vrot.slane %v210_v29, %v242_v4  ;;  %v1961_v4 = vld [vmem:[#allocation6 + $0x8] sm:$0xff]  }
  0xc3   :  { %1812 = vmatpush3.bf16.msra.mxu0 %v1933_v9  ;;  %1861 = vmatpush3.bf16.msra.mxu1 %v1946_v23 }
  0xc4   :  { %1813 = vmatprep.subr.bf16.mxu0 %v1934_v10  ;;  %1862 = vmatprep.subr.bf16.mxu1 %v2049_v21 }
  0xc7   :  { %1814 = vmatpush3.bf16.msra.mxu0 %v1935_v11  ;;  %1863 = vmatpush3.bf16.msra.mxu1 %v1947_v24 }
  0xc8   :  { %1815 = vmatprep.subr.bf16.mxu0 %v1936_v12  ;;  %1864 = vmatprep.subr.bf16.mxu1 %v2049_v21 }
  0xcb   :  { %1816 = vmatpush3.bf16.msra.mxu0 %v1937_v13  ;;  %1865 = vmatpush3.bf16.msra.mxu1 %v1948_v25 }
  0xcc   :  { %1817 = vmatprep.subr.bf16.mxu0 %v1938_v14  ;;  %1866 = vmatprep.subr.bf16.mxu1 %v2049_v21 }
  0xcf   :  { %1818 = vmatpush3.bf16.msra.mxu0 %v1939_v15 }
  0xd0   :  { %1819 = vmatprep.subr.bf16.mxu0 %v1940_v16 }
  0xd3   :  { %1820 = vmatpush3.bf16.msra.mxu0 %v1941_v17 }
  0xd4   :  { %1821 = vmatprep.subr.bf16.mxu0 %v1942_v18 }
  0xd7   :  { %1822 = vmatpush3.bf16.msra.mxu0 %v1943_v19 }
  0xd8   :  { %1876 = vmatprep.subr.bf16.mxu0 %v2049_v21 }
 0x14d   :  { %v936_v37 = vpop.f32.mrb[0].mxu0  ;;  %v979_v39 = vpop.f32.mrb[0].mxu1 }
 0x14e   :  { %v937_v38 = vadd.f32 %v936_v37, %v215_v33  ;;  %v938_v56 = vpop.f32.mrb[1].mxu0  ;;  %v980_v40 = vadd.f32 %v979_v39, %v223_v34  ;;  %v981_v42 = vpop.f32.mrb[1].mxu1 }
 0x14f   :  { %v939_v41 = vadd.f32 %v938_v56, %v219_v35  ;;  %v940_v43 = vpop.f32.mrb[2].mxu0  ;;  %v982_v45 = vadd.f32 %v981_v42, %v227_v36  ;;  %v983_v47 = vpop.f32.mrb[2].mxu1 }
 0x150   :  { %v1074_v44 = vmax.f32 %v937_v38, 0.0  ;;  %v941_v46 = vadd.f32 %v940_v43, %v215_v33  ;;  %v942_v48 = vpop.f32.mrb[3].mxu0  ;;  %v1076_v49 = vmax.f32 %v980_v40, 0.0  ;;  %v984_v51 = vadd.f32 %v983_v47, %v223_v34  ;;  %v985_v53 = vpop.f32.mrb[3].mxu1  ;;  %v1949_v43 = vld [vmem:[%s2299_s5 + $0x28] sm:$0xff]  }
 0x151   :  { %v1075_v50 = vmax.f32 %v939_v41, 0.0  ;;  %v943_v52 = vadd.f32 %v942_v48, %v219_v35  ;;  %v1077_v54 = vmax.f32 %v982_v45, 0.0  ;;  %v986_v57 = vadd.f32 %v985_v53, %v227_v36  ;;  %1867 = vmatpush3.bf16.msra.mxu1 %v1949_v43  ;;  %v1951_v45 = vld [vmem:[%s2299_s5 + $0x38] sm:$0xff]   ;;  %v1953_v47 = vld [vmem:[#allocation4 + $0x8] sm:$0xff]   ;;  %v1954_v48 = vld [vmem:[#allocation4 + $0x10] sm:$0xff]  }
 0x152   :  { %v1082_v55 = vmax.f32 %v941_v46, 0.0  ;;  %v1090_v58 = vmax.f32 %v1074_v44, %v1076_v49  ;;  %v1084_v59 = vmax.f32 %v984_v51, 0.0  ;;  %1868 = vmatprep.subr.bf16.mxu1 %v2049_v21  ;;  %v1950_v44 = vld [vmem:[%s2299_s5 + $0x30] sm:$0xff]   ;;  %v1952_v46 = vld [vmem:[#allocation4] sm:$0xff]   ;;  %v1955_v49 = vld [vmem:[#allocation4 + $0x18] sm:$0xff]  }
 0x153   :  { %v1083_v60 = vmax.f32 %v943_v52, 0.0  ;;  %v1091_v61 = vmax.f32 %v1075_v50, %v1077_v54  ;;  %v1085_v62 = vmax.f32 %v986_v57, 0.0  ;;  %v1956_v50 = vld [vmem:[#allocation4 + $0x20] sm:$0xff]   ;;  %v1957_v51 = vld [vmem:[#allocation4 + $0x28] sm:$0xff]  }
 0x154   :  { %v1092_v63 = vmax.f32 %v1082_v55, %v1084_v59  ;;  %v1763_v53 = vld [vmem:[%s2298_s4] ss:$0 sm:$0xff] }
 0x155   :  { %v1093_v0 = vmax.f32 %v1083_v60, %v1085_v62  ;;  %1869 = vmatpush3.bf16.msra.mxu1 %v1950_v44 }
 0x156   :  { %1870 = vmatprep.subr.bf16.mxu1 %v2049_v21 }
 0x159   :  { %1871 = vmatpush3.bf16.msra.mxu1 %v1951_v45 }
 0x15a   :  { %1896 = vmatprep.subr.bf16.mxu1 %v2049_v21 }
 0x18d   :  { %v1022_v9 = vpop.f32.mrb[4].mxu0  ;;  %v1065_v11 = vpop.f32.mrb[4].mxu1 }
 0x18e   :  { %v1023_v10 = vadd.f32 %v1022_v9, %v231_v5  ;;  %v1024_v12 = vpop.f32.mrb[5].mxu0  ;;  %v1066_v13 = vadd.f32 %v1065_v11, %v239_v6  ;;  %v1067_v15 = vpop.f32.mrb[5].mxu1 }
 0x18f   :  { %v1025_v14 = vadd.f32 %v1024_v12, %v235_v7  ;;  %v1026_v16 = vpop.f32.mrb[6].mxu0  ;;  %v1068_v18 = vadd.f32 %v1067_v15, %v243_v8  ;;  %v1069_v20 = vpop.f32.mrb[6].mxu1 }
 0x190   :  { %v1078_v17 = vmax.f32 %v1023_v10, 0.0  ;;  %v1027_v19 = vadd.f32 %v1026_v16, %v231_v5  ;;  %v1028_v22 = vpop.f32.mrb[7].mxu0  ;;  %v1080_v23 = vmax.f32 %v1066_v13, 0.0  ;;  %v1070_v25 = vadd.f32 %v1069_v20, %v239_v6  ;;  %v1071_v27 = vpop.f32.mrb[7].mxu1  ;;  %v1962_v5 = vld [vmem:[#allocation6 + $0x10] sm:$0xff]   ;;  %v1963_v6 = vld [vmem:[#allocation6 + $0x18] sm:$0xff]  }
 0x191   :  { %v1079_v24 = vmax.f32 %v1025_v14, 0.0  ;;  %v1029_v26 = vadd.f32 %v1028_v22, %v235_v7  ;;  %v1081_v28 = vmax.f32 %v1068_v18, 0.0  ;;  %v1072_v30 = vadd.f32 %v1071_v27, %v243_v8  ;;  %v1780_v7 = vld [vmem:[%s2300_s6] ss:$0 sm:$0xff]  ;;  %v1965_v18 = vld [vmem:[#allocation6 + $0x28] sm:$0xff]   ;;  %v1967_v20 = vld [vmem:[#allocation6 + $0x38] sm:$0xff]  }
 0x192   :  { %v1086_v29 = vmax.f32 %v1027_v19, 0.0  ;;  %v1094_v31 = vmax.f32 %v1078_v17, %v1080_v23  ;;  %v1088_v32 = vmax.f32 %v1070_v25, 0.0  ;;  %v1964_v17 = vld [vmem:[#allocation6 + $0x20] sm:$0xff]   ;;  %v1966_v19 = vld [vmem:[#allocation6 + $0x30] sm:$0xff]  }
 0x193   :  { %v1087_v33 = vmax.f32 %v1029_v26, 0.0  ;;  %v1095_v34 = vmax.f32 %v1079_v24, %v1081_v28  ;;  %v1089_v35 = vmax.f32 %v1072_v30, 0.0  ;;  %v1789_v22 = vld [vmem:[%s2302_s8] ss:$0 sm:$0xff] }
 0x194   :  { %v1098_v36 = vmax.f32 %v1090_v58, %v1094_v31  ;;  %v1096_v37 = vmax.f32 %v1086_v29, %v1088_v32 }
 0x195   :  { %v1099_v38 = vmax.f32 %v1091_v61, %v1095_v34  ;;  %v1097_v39 = vmax.f32 %v1087_v33, %v1089_v35 }
 0x196   :  { %v1100_v56 = vmax.f32 %v1092_v63, %v1096_v37 }
 0x197   :  { %v1101_v40 = vmax.f32 %v1093_v0, %v1097_v39 }
 0x198   :  { %v1102_v41 = vpack.c.bf16 %v1100_v56, %v1098_v36 }
 0x199   :  { %v1103_v42 = vpack.c.bf16 %v1101_v40, %v1099_v38 }
 0x19b   :  { %1271 = vmatprep.mubr.bf16.mxu0 %v1103_v42 }
 0x19c   :  { %1272 = vmatmul.mubr.bf16.vlgmr.msra.gmra.mrb[8].mxu0 %v1102_v41 }
 0x19d   :  { %1892 = vmatprep.mubr.msk.bf16.mxu0 %vm2050_vm0, %v2049_v21  ;;  %1877 = vmatpush3.bf16.msra.mxu0 %v1952_v46 }
 0x19e   :  { %1878 = vmatprep.subr.bf16.mxu0 %v2049_v21 }
 0x1a1   :  { %1879 = vmatpush3.bf16.msra.mxu0 %v1953_v47 }
 0x1a2   :  { %1880 = vmatprep.subr.bf16.mxu0 %v2049_v21 }
 0x1a5   :  { %1881 = vmatpush3.bf16.msra.mxu0 %v1954_v48 }
 0x1a6   :  { %1882 = vmatprep.subr.bf16.mxu0 %v2049_v21 }
 0x1a9   :  { %1883 = vmatpush3.bf16.msra.mxu0 %v1955_v49 }
 0x1aa   :  { %1884 = vmatprep.subr.bf16.mxu0 %v2049_v21 }
 0x1ad   :  { %1885 = vmatpush3.bf16.msra.mxu0 %v1956_v50 }
 0x1ae   :  { %1886 = vmatprep.subr.bf16.mxu0 %v2049_v21 }
 0x1b1   :  { %1887 = vmatpush3.bf16.msra.mxu0 %v1957_v51 }
 0x1b2   :  { %1888 = vmatprep.subr.bf16.mxu0 %v2049_v21 }
 0x1b5   :  { %1889 = vmatpush3.bf16.msra.mxu0 %v1958_v1 }
 0x1b6   :  { %1890 = vmatprep.subr.bf16.mxu0 %v2049_v21 }
 0x1b9   :  { %1891 = vmatpush3.bf16.msra.mxu0 %v1959_v2 }
 0x26f   :  { %v1823_v52 = vpop.f32.mrb[8].mxu0 }
 0x270   :  { %v1824_v54 = vpop.f32.mrb[9].mxu0 }
 0x271   :  { %v1825_v55 = vadd.f32 %v1824_v54, %v1823_v52  ;;  %v1826_v57 = vpop.f32.mrb[10].mxu0 }
 0x272   :  { %v1827_v58 = vpop.f32.mrb[11].mxu0 }
 0x273   :  { %v1274_v59 = vadd.f32 %v1825_v55, %v1763_v53  ;;  %v1828_v60 = vadd.f32 %v1827_v58, %v1826_v57 }
 0x275   :  { %v1277_v61 = vadd.f32 %v1828_v60, %v1763_v53  ;;  %v1280_v62 = vmax.f32 %v1274_v59, 0.0 }
 0x277   :  { %v1281_v63 = vmax.f32 %v1277_v61, 0.0 }
 0x279   :  { %v1282_v0 = vpack.c.bf16 %v1281_v63, %v1280_v62 }
 0x27b   :  { %1873 = vmatmul.mubr.bf16.vlgmr.msra.gmra.mrb[8].mxu1 %v1282_v0 }
 0x27c   :  { %1912 = vmatprep.mubr.msk.bf16.mxu1 %vm2050_vm0, %v2049_v21  ;;  %1897 = vmatpush3.bf16.msra.mxu1 %v1960_v3 }
 0x27d   :  { %1898 = vmatprep.subr.bf16.mxu1 %v2049_v21 }
 0x280   :  { %1899 = vmatpush3.bf16.msra.mxu1 %v1961_v4 }
 0x281   :  { %1900 = vmatprep.subr.bf16.mxu1 %v2049_v21 }
 0x284   :  { %1901 = vmatpush3.bf16.msra.mxu1 %v1962_v5 }
 0x285   :  { %1902 = vmatprep.subr.bf16.mxu1 %v2049_v21 }
 0x288   :  { %1903 = vmatpush3.bf16.msra.mxu1 %v1963_v6 }
 0x289   :  { %1904 = vmatprep.subr.bf16.mxu1 %v2049_v21 }
 0x28c   :  { %1905 = vmatpush3.bf16.msra.mxu1 %v1964_v17 }
 0x28d   :  { %1906 = vmatprep.subr.bf16.mxu1 %v2049_v21 }
 0x290   :  { %1907 = vmatpush3.bf16.msra.mxu1 %v1965_v18 }
 0x291   :  { %1908 = vmatprep.subr.bf16.mxu1 %v2049_v21 }
 0x294   :  { %1909 = vmatpush3.bf16.msra.mxu1 %v1966_v19 }
 0x295   :  { %1910 = vmatprep.subr.bf16.mxu1 %v2049_v21  ;;  %v1798_v21 = vld [vmem:[%s2304_s10] ss:$0 sm:$0xff] }
 0x298   :  { %1911 = vmatpush3.bf16.msra.mxu1 %v1967_v20 }
 0x34e   :  { %v1388_v8 = vpop.f32.mrb[8].mxu1 }
 0x34f   :  { %v1389_v9 = vadd.f32 %v1780_v7, %v1388_v8  ;;  %v1874_v10 = vpop.f32.mrb[9].mxu1 }
 0x350   :  { %v1391_v11 = vpop.f32.mrb[10].mxu1 }
 0x351   :  { %v1392_v12 = vadd.f32 %v1780_v7, %v1391_v11  ;;  %v1875_v13 = vpop.f32.mrb[11].mxu1  ;;  %v1395_v14 = vmax.f32 %v1389_v9, 0.0 }
 0x353   :  { %v1396_v15 = vmax.f32 %v1392_v12, 0.0 }
 0x355   :  { %v1397_v16 = vpack.c.bf16 %v1396_v15, %v1395_v14 }
 0x357   :  { %1893 = vmatmul.mubr.bf16.vlgmr.msra.gmra.mrb[12].mxu0 %v1397_v16 }
 0x42a   :  { %v1503_v23 = vpop.f32.mrb[12].mxu0 }
 0x42b   :  { %v1504_v24 = vadd.f32 %v1789_v22, %v1503_v23  ;;  %v1894_v25 = vpop.f32.mrb[13].mxu0 }
 0x42c   :  { %v1506_v26 = vpop.f32.mrb[14].mxu0 }
 0x42d   :  { %v1507_v27 = vadd.f32 %v1789_v22, %v1506_v26  ;;  %v1895_v28 = vpop.f32.mrb[15].mxu0  ;;  %1968 = vtanh.f32 %v1504_v24 }
 0x42f   :  { %1970 = vtanh.f32 %v1507_v27 }
 0x437   :  { %v1969_v29 = vpop.eup %1968 }
 0x439   :  { %v1971_v30 = vpop.eup %1970 }
 0x43a   :  { %v1512_v31 = vpack.c.bf16 %v1971_v30, %v1969_v29 }
 0x43c   :  { %1913 = vmatmul.mubr.bf16.vlgmr.msra.gmra.mrb[12].mxu1 %v1512_v31 }
 0x50f   :  { %v1618_v32 = vpop.f32.mrb[12].mxu1 }
 0x510   :  { %v1619_v33 = vadd.f32 %v1798_v21, %v1618_v32  ;;  %v1914_v34 = vpop.f32.mrb[13].mxu1 }
 0x511   :  { %v1621_v35 = vpop.f32.mrb[14].mxu1 }
 0x512   :  { %1625 = vst [vmem:[%s2305_s11] sm:$0xff] %v1619_v33  ;;  %v1622_v36 = vadd.f32 %v1798_v21, %v1621_v35  ;;  %v1915_v37 = vpop.f32.mrb[15].mxu1 }
 0x514   :  { %1626 = vst [vmem:[%s2305_s11 + $0x8] sm:$0xff] %v1622_v36 }
 0x515   :  { %1631 = vsyncpa [#allocation3], 1 }
 0x516   :  { %1632 = vsyncpa [#allocation5], 1 }

</bundles_post_ra>
